<compile_context>
chip_gen: v7x
topology: tpu7x:2x2x1
jax: 0.10.0
libtpu: 0.0.40
codegen_flags: <defaults>
</compile_context>

<pallas_src>
import jax
import jax.numpy as jnp
from jax.experimental import pallas as pl
from jax.experimental.pallas import tpu as pltpu


def _leaky_relu(x, slope=0.2):
    # max(x, slope*x) == LeakyReLU(slope) for 0 < slope < 1; single VALU op.
    return jnp.maximum(x, slope * x)


def discriminator_kernel(z_ref, w1_ref, b1_ref, w2_ref, b2_ref, w3_ref, b3_ref,
                         out_ref):
    # Cast to bf16 only at the MXU boundary (free VPU work hidden under the
    # DMA/MXU); accumulation and the bias/activation epilogue stay in f32.
    z_bf = z_ref[...].astype(jnp.bfloat16)

    # Layer 1: Linear(latent_dim -> 512), bf16 operands on the MXU, f32 acc.
    h1 = jnp.dot(z_bf, w1_ref[...].astype(jnp.bfloat16),
                 preferred_element_type=jnp.float32) + b1_ref[...]
    h1 = _leaky_relu(h1)

    # Layer 2: Linear(512 -> 256).
    h2 = jnp.dot(h1.astype(jnp.bfloat16), w2_ref[...].astype(jnp.bfloat16),
                 preferred_element_type=jnp.float32) + b2_ref[...]
    h2 = _leaky_relu(h2)

    # Layer 3: Linear(256 -> 1) as a lane reduction (an N=1 MXU matmul would
    # waste a push/pop for a single output column).  The (tb,) result is laid
    # out on lanes (XLU relayout) so the store below is lane-dense.
    logit = jnp.sum(h2 * w3_ref[...], axis=-1) + b3_ref[0]

    # Numerically safe sigmoid: clamp so exp never overflows (sigmoid(+-30)
    # already saturates far below the bf16-level tolerance); exp + approx
    # reciprocal both issue on the otherwise-idle EUP.
    logit = jnp.clip(logit, -30.0, 30.0)
    out_ref[...] = pl.reciprocal(1.0 + jnp.exp(-logit),
                                 approx=True).astype(out_ref.dtype)


def discriminator_forward(z, params, *, batch_tile=1024):
    """z: (B, latent_dim) float32. Returns validity (B, 1) float32.

    `params` = (w1, b1, w2, b2, w3_row, b3), all f32, already in kernel layout
    (weights (in, out), the 256->1 head as a (1, 256) row, b3 as (1,)).  No
    per-call casting / reshaping happens here, so nothing extra hits HBM when
    this runs every step of a training loop.
    """
    w1, b1, w2, b2, w3_row, b3 = params
    B, latent_dim = z.shape

    # Batch tile: multiple of 16 (bf16 packs 16 rows per vreg), large enough to
    # amortize per-grid-step overhead, and capped so the grid keeps >= 2 tiles
    # when the batch allows it (feeds both v7x TensorCores).
    batch_tile = max(16, (int(batch_tile) // 16) * 16)
    b_round = pl.cdiv(B, 16) * 16
    tb = min(batch_tile, b_round)
    if b_round >= 32 and tb * 2 > b_round:
        tb = pl.cdiv(pl.cdiv(b_round, 2), 16) * 16
    b_pad = pl.cdiv(B, tb) * tb
    num_tiles = b_pad // tb

    if b_pad != B:
        z = jnp.pad(z, ((0, b_pad - B), (0, 0)))

    # Weights/biases: constant index_map -> DMA'd once, VMEM-resident across
    # all batch tiles (~0.6 MiB f32; h1/h2 at tb=1024 add ~3 MiB — comfortably
    # inside v7x's 32 MiB scoped VMEM default, so no explicit limit needed).
    resident = lambda a: pl.BlockSpec(a.shape, lambda i: (0,) * a.ndim)

    out = pl.pallas_call(
        discriminator_kernel,
        # Lane-dense output: one (tb,) row of scores per grid step.
        out_shape=jax.ShapeDtypeStruct((num_tiles, tb), jnp.float32),
        grid=(num_tiles,),
        in_specs=[
            pl.BlockSpec((tb, latent_dim), lambda i: (i, 0)),   # z batch tile
            resident(w1), resident(b1),
            resident(w2), resident(b2),
            resident(w3_row),
            pl.BlockSpec(memory_space=pltpu.MemorySpace.SMEM),  # b3 scalar
        ],
        out_specs=pl.BlockSpec((None, tb), lambda i: (i, 0)),
        compiler_params=pltpu.CompilerParams(
            dimension_semantics=("parallel",)),
    )(z, w1, b1, w2, b2, w3_row, b3)

    # (num_tiles, tb) -> (B, 1): contiguous row-major reshape, effectively free.
    return out.reshape(b_pad, 1)[:B]


def init_params(key, latent_dim):
    """Deterministic PyTorch-Linear-style init, stored ONCE in kernel layout:
    weights as (in, out) f32, the 256->1 head as a (1, 256) row + (1,) bias."""
    dims = [(latent_dim, 512), (512, 256), (256, 1)]
    flat = []
    for i, (fan_in, fan_out) in enumerate(dims):
        kw, kb = jax.random.split(jax.random.fold_in(key, i))
        bound = 1.0 / jnp.sqrt(jnp.float32(fan_in))
        w = jax.random.uniform(kw, (fan_in, fan_out), jnp.float32, -bound, bound)
        b = jax.random.uniform(kb, (1, fan_out), jnp.float32, -bound, bound)
        flat += [w, b]
    w1, b1, w2, b2, w3, b3 = flat
    return (w1, b1, w2, b2, w3.reshape(1, -1), b3.reshape(1))


def reference_forward(z, params):
    """Pure-JAX f32 reference of the PyTorch module."""
    w1, b1, w2, b2, w3_row, b3 = params
    h1 = jax.nn.leaky_relu(z @ w1 + b1, 0.2)
    h2 = jax.nn.leaky_relu(h1 @ w2 + b2, 0.2)
    return jax.nn.sigmoid(h2 @ w3_row.T + b3)


if __name__ == "__main__":
    LATENT_DIM = 32   # stand-in for opt.latent_dim
    BATCH = 8

    key = jax.random.PRNGKey(0)
    kz, kp = jax.random.split(key)
    z = jax.random.normal(kz, (BATCH, LATENT_DIM), jnp.float32)
    params = init_params(kp, LATENT_DIM)

    validity = discriminator_forward(z, params)
    jax.block_until_ready(validity)

    ref = reference_forward(z, params)
    assert validity.shape == (BATCH, 1)
    # bf16 MXU operands + approx EUP reciprocal => compare at bf16-level tol.
    assert jnp.allclose(validity, ref, atol=2e-2, rtol=0.0), "mismatch vs reference"

    print("KERNEL_OK")
</pallas_src>

<mosaic_0001>
module attributes {stable_mosaic.version = 11 : i64} {
  func.func @discriminator_kernel(%arg0: i32, %arg1: memref<16x32xf32, #tpu.memory_space<vmem>>, %arg2: memref<32x512xf32, #tpu.memory_space<vmem>>, %arg3: memref<1x512xf32, #tpu.memory_space<vmem>>, %arg4: memref<512x256xf32, #tpu.memory_space<vmem>>, %arg5: memref<1x256xf32, #tpu.memory_space<vmem>>, %arg6: memref<1x256xf32, #tpu.memory_space<vmem>>, %arg7: memref<1xf32, #tpu.memory_space<smem>>, %arg8: memref<1x16xf32, #tpu.memory_space<vmem>>) attributes {dimension_semantics = [#tpu.dimension_semantics<parallel>], iteration_bounds = array<i64: 1>, scalar_prefetch = 0 : i64, scratch_operands = 0 : i64, tpu.core_type = #tpu.core_type<tc>, window_params = [{transform_indices = @transform_0, window_bounds = array<i64: 16, 32>}, {pipeline_mode = #tpu.pipeline_mode<synchronous>, transform_indices = @transform_1, window_bounds = array<i64: 32, 512>}, {pipeline_mode = #tpu.pipeline_mode<synchronous>, transform_indices = @transform_2, window_bounds = array<i64: 1, 512>}, {pipeline_mode = #tpu.pipeline_mode<synchronous>, transform_indices = @transform_3, window_bounds = array<i64: 512, 256>}, {pipeline_mode = #tpu.pipeline_mode<synchronous>, transform_indices = @transform_4, window_bounds = array<i64: 1, 256>}, {pipeline_mode = #tpu.pipeline_mode<synchronous>, transform_indices = @transform_5, window_bounds = array<i64: 1, 256>}, {transform_indices = @transform_6, window_bounds = array<i64: 1>}, {transform_indices = @transform_7, window_bounds = array<i64: 1, 16>}]} {
    %c0 = arith.constant 0 : index
    %c0_0 = arith.constant 0 : index
    %0 = vector.load %arg1[%c0, %c0_0] : memref<16x32xf32, #tpu.memory_space<vmem>>, vector<16x32xf32>
    %1 = arith.truncf %0 : vector<16x32xf32> to vector<16x32xbf16>
    %c0_1 = arith.constant 0 : index
    %c0_2 = arith.constant 0 : index
    %2 = vector.load %arg2[%c0_1, %c0_2] : memref<32x512xf32, #tpu.memory_space<vmem>>, vector<32x512xf32>
    %3 = arith.truncf %2 : vector<32x512xf32> to vector<32x512xbf16>
    %cst = arith.constant dense<0.000000e+00> : vector<16x512xf32>
    %4 = tpu.matmul %1, %3, %cst {dimension_numbers = #tpu.dot_dimension_numbers<[1], [0], [0], [1], [0, 0, 1, 1], [], []>} : vector<16x32xbf16>, vector<32x512xbf16>, vector<16x512xf32> -> vector<16x512xf32>
    %c0_3 = arith.constant 0 : index
    %c0_4 = arith.constant 0 : index
    %5 = vector.load %arg3[%c0_3, %c0_4] : memref<1x512xf32, #tpu.memory_space<vmem>>, vector<1x512xf32>
    %6 = vector.broadcast %5 : vector<1x512xf32> to vector<16x512xf32>
    %7 = arith.addf %4, %6 : vector<16x512xf32>
    %cst_5 = arith.constant 2.000000e-01 : f32
    %8 = vector.broadcast %cst_5 : f32 to vector<16x512xf32>
    %9 = arith.mulf %8, %7 : vector<16x512xf32>
    %10 = arith.maximumf %7, %9 : vector<16x512xf32>
    %11 = arith.truncf %10 : vector<16x512xf32> to vector<16x512xbf16>
    %c0_6 = arith.constant 0 : index
    %c0_7 = arith.constant 0 : index
    %12 = vector.load %arg4[%c0_6, %c0_7] : memref<512x256xf32, #tpu.memory_space<vmem>>, vector<512x256xf32>
    %13 = arith.truncf %12 : vector<512x256xf32> to vector<512x256xbf16>
    %cst_8 = arith.constant dense<0.000000e+00> : vector<16x256xf32>
    %14 = tpu.matmul %11, %13, %cst_8 {dimension_numbers = #tpu.dot_dimension_numbers<[1], [0], [0], [1], [0, 0, 1, 1], [], []>} : vector<16x512xbf16>, vector<512x256xbf16>, vector<16x256xf32> -> vector<16x256xf32>
    %c0_9 = arith.constant 0 : index
    %c0_10 = arith.constant 0 : index
    %15 = vector.load %arg5[%c0_9, %c0_10] : memref<1x256xf32, #tpu.memory_space<vmem>>, vector<1x256xf32>
    %16 = vector.broadcast %15 : vector<1x256xf32> to vector<16x256xf32>
    %17 = arith.addf %14, %16 : vector<16x256xf32>
    %cst_11 = arith.constant 2.000000e-01 : f32
    %18 = vector.broadcast %cst_11 : f32 to vector<16x256xf32>
    %19 = arith.mulf %18, %17 : vector<16x256xf32>
    %20 = arith.maximumf %17, %19 : vector<16x256xf32>
    %c0_12 = arith.constant 0 : index
    %c0_13 = arith.constant 0 : index
    %21 = vector.load %arg6[%c0_12, %c0_13] : memref<1x256xf32, #tpu.memory_space<vmem>>, vector<1x256xf32>
    %22 = vector.broadcast %21 : vector<1x256xf32> to vector<16x256xf32>
    %23 = arith.mulf %20, %22 : vector<16x256xf32>
    %cst_14 = arith.constant dense<0.000000e+00> : vector<16xf32>
    %24 = vector.multi_reduction <add>, %23, %cst_14 [1] : vector<16x256xf32> to vector<16xf32>
    %c0_15 = arith.constant 0 : index
    %25 = memref.load %arg7[%c0_15] : memref<1xf32, #tpu.memory_space<smem>>
    %26 = vector.broadcast %25 : f32 to vector<16xf32>
    %27 = arith.addf %24, %26 : vector<16xf32>
    %cst_16 = arith.constant -3.000000e+01 : f32
    %cst_17 = arith.constant 3.000000e+01 : f32
    %28 = vector.broadcast %cst_16 : f32 to vector<16xf32>
    %29 = arith.maximumf %28, %27 : vector<16xf32>
    %30 = vector.broadcast %cst_17 : f32 to vector<16xf32>
    %31 = arith.minimumf %30, %29 : vector<16xf32>
    %cst_18 = arith.constant 0.000000e+00 : f32
    %32 = vector.broadcast %cst_18 : f32 to vector<16xf32>
    %33 = arith.subf %32, %31 : vector<16xf32>
    %34 = math.exp %33 : vector<16xf32>
    %cst_19 = arith.constant 1.000000e+00 : f32
    %35 = vector.broadcast %cst_19 : f32 to vector<16xf32>
    %36 = arith.addf %35, %34 : vector<16xf32>
    %37 = tpu.reciprocal %36 {approx = true} : vector<16xf32> -> vector<16xf32>
    %c0_20 = arith.constant 0 : index
    %c0_21 = arith.constant 0 : index
    %38 = vector.load %arg8[%c0_20, %c0_21] : memref<1x16xf32, #tpu.memory_space<vmem>>, vector<1x16xf32>
    %39 = vector.shape_cast %38 : vector<1x16xf32> to vector<16xf32>
    %40 = vector.shape_cast %37 : vector<16xf32> to vector<1x16xf32>
    tpu.vector_store %arg8[%c0_20, %c0_21], %40 {strides = array<i32>} : memref<1x16xf32, #tpu.memory_space<vmem>>, vector<1x16xf32>,
    return
  }
  func.func @transform_0(%arg0: i32) -> (i32, i32) {
    %c0_i32 = arith.constant 0 : i32
    %c0_i32_0 = arith.constant 0 : i32
    return %arg0, %c0_i32 : i32, i32
  }
  func.func @transform_1(%arg0: i32) -> (i32, i32) {
    %c0_i32 = arith.constant 0 : i32
    %c0_i32_0 = arith.constant 0 : i32
    %c0_i32_1 = arith.constant 0 : i32
    return %c0_i32, %c0_i32_0 : i32, i32
  }
  func.func @transform_2(%arg0: i32) -> (i32, i32) {
    %c0_i32 = arith.constant 0 : i32
    %c0_i32_0 = arith.constant 0 : i32
    %c0_i32_1 = arith.constant 0 : i32
    return %c0_i32, %c0_i32_0 : i32, i32
  }
  func.func @transform_3(%arg0: i32) -> (i32, i32) {
    %c0_i32 = arith.constant 0 : i32
    %c0_i32_0 = arith.constant 0 : i32
    %c0_i32_1 = arith.constant 0 : i32
    return %c0_i32, %c0_i32_0 : i32, i32
  }
  func.func @transform_4(%arg0: i32) -> (i32, i32) {
    %c0_i32 = arith.constant 0 : i32
    %c0_i32_0 = arith.constant 0 : i32
    %c0_i32_1 = arith.constant 0 : i32
    return %c0_i32, %c0_i32_0 : i32, i32
  }
  func.func @transform_5(%arg0: i32) -> (i32, i32) {
    %c0_i32 = arith.constant 0 : i32
    %c0_i32_0 = arith.constant 0 : i32
    %c0_i32_1 = arith.constant 0 : i32
    return %c0_i32, %c0_i32_0 : i32, i32
  }
  func.func @transform_6(%arg0: i32) -> i32 {
    %c0_i32 = arith.constant 0 : i32
    %c0_i32_0 = arith.constant 0 : i32
    return %c0_i32 : i32
  }
  func.func @transform_7(%arg0: i32) -> (i32, i32) {
    %c0_i32 = arith.constant 0 : i32
    %c0_i32_0 = arith.constant 0 : i32
    return %arg0, %c0_i32 : i32, i32
  }
}

</mosaic_0001>

<bundles_post_ra>
// kernel: tpu_custom_call.1
= control target key start
LH: loop header
LB: loop body
LE: loop exit
PB: predicated region body
PF: predicated region fallthrough
CT: control target
= control target key end

     0   :  { %13 = vsyncpa [#allocation4], 0  ;;  %s859_s0 = inlined_call_operand.hbm [shape: f32[16,32], index: 0, kind: input, shape index: {}]   ;;  %s860_s1 = inlined_call_operand.hbm [shape: f32[32,512], index: 1, kind: input, shape index: {}]   ;;  %s861_s2 = inlined_call_operand.vmem [shape: f32[1,512], index: 2, kind: input, shape index: {}]   ;;  %s862_s3 = inlined_call_operand.hbm [shape: f32[512,256], index: 3, kind: input, shape index: {}]   ;;  %s863_s4 = inlined_call_operand.vmem [shape: f32[1,256], index: 4, kind: input, shape index: {}]   ;;  %s864_s5 = inlined_call_operand.vmem [shape: f32[1,256], index: 5, kind: input, shape index: {}]   ;;  %s865_s6 = inlined_call_operand.<no memory space> [shape: f32[1], index: 6, kind: input, shape index: {}]   ;;  %s866_s7 = inlined_call_operand.hbm [shape: f32[1,16], index: 7, kind: output, shape index: {}]  }
   0x1   :  { %14 = vsyncpa [#allocation7], 0 }
   0x2   :  { %15 = vsyncpa [#allocation5], 0  ;;  %s726_s24 = smov [#allocation6]   ;;  %s632_s28 = scalar_lea.hbm %s860_s1, 2048 }
   0x3   :  { %s33_s25 = sshll.u32 %s726_s24, 4  ;;  %p633_p0 = scmp.ne.s32.totalorder %s860_s1, %s632_s28  ;;  %s34_s25 = int_to_ptr.vmem [resolvable:$true] %s33_s25 }
   0x4   :  { %p636_p1 = scmp.lt.u32.totalorder %s632_s28, %s860_s1 }
   0x6   :  { %p638_p2 = pnand %p636_p1, %p633_p0 }
   0x8   :  { %641 = shalt.err (!%p638_p2)
}
   0x9   :  { %s642_s10 = scalar_lea.vmem %s34_s25, 2048  ;;  %p647_p4 = scmp.lt.s32.totalorder %s34_s25, %s34_s25 }
   0xa   :  { %p643_p3 = scmp.ne.s32.totalorder %s34_s25, %s642_s10  ;;  %p648_p5 = scmp.lt.s32.totalorder %s642_s10, %s642_s10 }
   0xc   :  { %p649_p6 = por %p648_p5, %p647_p4 }
   0xe   :  { %p650_p7 = pnand %p649_p6, %p643_p3 }
  0x10   :  { %653 = shalt.err (!%p650_p7)
}
  0x11   :  { %s727_s11 = smov 512   ;;  %s728_s12 = smov 32  }
  0x12   :  { %39 = dma.hbm_to_vmem [thread:$0]  %s860_s1, 2048, %s34_s25, [#allocation7], %s727_s11, %s727_s11, %s728_s12  }
  0x13   :  { %s729_s15 = smov [#allocation3]   ;;  %s654_s19 = scalar_lea.hbm %s859_s0, 256 }
  0x14   :  { %s21_s16 = sshll.u32 %s729_s15, 4  ;;  %p655_p8 = scmp.ne.s32.totalorder %s859_s0, %s654_s19  ;;  %s22_s16 = int_to_ptr.vmem [resolvable:$true] %s21_s16 }
  0x15   :  { %p658_p9 = scmp.lt.u32.totalorder %s654_s19, %s859_s0 }
  0x17   :  { %p660_p10 = pnand %p658_p9, %p655_p8 }
  0x19   :  { %663 = shalt.err (!%p660_p10)
}
  0x1a   :  { %s664_s24 = scalar_lea.vmem %s22_s16, 256  ;;  %p669_p12 = scmp.lt.s32.totalorder %s22_s16, %s22_s16 }
  0x1b   :  { %p665_p11 = scmp.ne.s32.totalorder %s22_s16, %s664_s24  ;;  %p670_p13 = scmp.lt.s32.totalorder %s664_s24, %s664_s24 }
  0x1d   :  { %p671_p0 = por %p670_p13, %p669_p12 }
  0x1f   :  { %p672_p1 = pnand %p671_p0, %p665_p11 }
  0x21   :  { %675 = shalt.err (!%p672_p1)
}
  0x22   :  { %s730_s1 = smov 128   ;;  %s731_s25 = smov 8  }
  0x23   :  { %27 = dma.hbm_to_vmem [thread:$0]  %s859_s0, 256, %s22_s16, [#allocation4], %s730_s1, %s730_s1, %s731_s25  }
  0x24   :  { %s732_s28 = smov [#allocation8]   ;;  %s676_s9 = scalar_lea.hbm %s862_s3, 16384 }
  0x25   :  { %s47_s29 = sshll.u32 %s732_s28, 4  ;;  %p677_p2 = scmp.ne.s32.totalorder %s862_s3, %s676_s9  ;;  %s48_s29 = int_to_ptr.vmem [resolvable:$true] %s47_s29 }
  0x26   :  { %p680_p3 = scmp.lt.u32.totalorder %s676_s9, %s862_s3 }
  0x28   :  { %p682_p4 = pnand %p680_p3, %p677_p2 }
  0x2a   :  { %685 = shalt.err (!%p682_p4)
}
  0x2b   :  { %s686_s14 = scalar_lea.vmem %s48_s29, 16384  ;;  %p691_p6 = scmp.lt.s32.totalorder %s48_s29, %s48_s29 }
  0x2c   :  { %p687_p5 = scmp.ne.s32.totalorder %s48_s29, %s686_s14  ;;  %p692_p7 = scmp.lt.s32.totalorder %s686_s14, %s686_s14 }
  0x2e   :  { %p693_p8 = por %p692_p7, %p691_p6 }
  0x30   :  { %p694_p9 = pnand %p693_p8, %p687_p5 }
  0x32   :  { %697 = shalt.err (!%p694_p9)
}
  0x33   :  { %s733_s0 = smov 256   ;;  %s734_s15 = smov 16  }
  0x34   :  { %53 = dma.hbm_to_vmem [thread:$0]  %s862_s3, 16384, %s48_s29, [#allocation7], %s733_s0, %s733_s0, %s734_s15  }
  0x35   :  { %720 = dma.done.wait [#allocation4], 256  }
  0x36   :  { %721 = vsyncadd [#allocation4], 4294967040 }
  0x37   :  { %722 = dma.done.wait [#allocation7], 18432  }
  0x38   :  { %723 = vsyncadd [#allocation7], 4294948864  ;;  %v735_v0 = vmov 0   ;;  %v74_v1 = vld [vmem:[#allocation6 + $0x8] sm:$0xff]  ;;  %v76_v3 = vld [vmem:[#allocation6 + $0x18] sm:$0xff]  ;;  %vm119_vm0 = vcmask 261120  }
  0x39   :  { %155 = vmatprep.mubr.bf16.mxu0 %v735_v0  ;;  %198 = vmatprep.mubr.bf16.mxu1 %v735_v0  ;;  %v78_v2 = vld [vmem:[#allocation6 + $0x28] sm:$0xff]  ;;  %v80_v5 = vld [vmem:[#allocation6 + $0x38] sm:$0xff]  ;;  %v73_v6 = vld [vmem:[#allocation6] sm:$0xff]  ;;  %vm580_vm1 = vcmask 130112   ;;  %vm583_vm2 = vcmask 122880  }
  0x3a   :  { %v90_v4 = vpack.c.bf16 %v78_v2, %v74_v1  ;;  %v77_v7 = vld [vmem:[#allocation6 + $0x20] sm:$0xff]  ;;  %v92_v8 = vpack.c.bf16 %v80_v5, %v76_v3  ;;  %v75_v10 = vld [vmem:[#allocation6 + $0x10] sm:$0xff]  ;;  %v82_v12 = vld [vmem:[#allocation6 + $0x48] sm:$0xff] }
  0x3b   :  { %v89_v9 = vpack.c.bf16 %v77_v7, %v73_v6  ;;  %v79_v11 = vld [vmem:[#allocation6 + $0x30] sm:$0xff]  ;;  %v86_v14 = vld [vmem:[#allocation6 + $0x68] sm:$0xff]  ;;  %v84_v15 = vld [vmem:[#allocation6 + $0x58] sm:$0xff] }
  0x3c   :  { %123 = vmatprep.subr.bf16.mxu0 %v90_v4  ;;  %v91_v13 = vpack.c.bf16 %v79_v11, %v75_v10  ;;  %v88_v16 = vld [vmem:[#allocation6 + $0x78] sm:$0xff]  ;;  %166 = vmatprep.subr.bf16.mxu1 %v92_v8  ;;  %v94_v17 = vpack.c.bf16 %v86_v14, %v82_v12  ;;  %v81_v19 = vld [vmem:[#allocation6 + $0x40] sm:$0xff]  ;;  %v83_v21 = vld [vmem:[#allocation6 + $0x50] sm:$0xff] }
  0x3d   :  { %124 = vmatpush1.bf16.msra.mxu0 %v89_v9  ;;  %v96_v18 = vpack.c.bf16 %v88_v16, %v84_v15  ;;  %v85_v20 = vld [vmem:[#allocation6 + $0x60] sm:$0xff]  ;;  %v87_v23 = vld [vmem:[#allocation6 + $0x70] sm:$0xff]  ;;  %v71_v25 = vld [vmem:[#allocation3 + $0x8] sm:$0xff] }
  0x3e   :  { %167 = vmatpush1.bf16.msra.mxu1 %v91_v13  ;;  %v93_v22 = vpack.c.bf16 %v85_v20, %v81_v19  ;;  %v70_v24 = vld [vmem:[#allocation3] sm:$0xff]  ;;  %125 = vmatprep.subr.bf16.mxu0 %v94_v17  ;;  %v95_v26 = vpack.c.bf16 %v87_v23, %v83_v21  ;;  %v230_v27 = vld [vmem:[#allocation8 + $0x8] sm:$0xff]  ;;  %v232_v28 = vld [vmem:[#allocation8 + $0x18] sm:$0xff] }
  0x3f   :  { %168 = vmatprep.subr.bf16.mxu1 %v96_v18  ;;  %v294_v29 = vld [vmem:[#allocation8 + $0x208] sm:$0xff]  ;;  %v72_v30 = vpack.c.bf16 %v71_v25, %v70_v24  ;;  %v358_v31 = vpack.c.bf16 %v232_v28, %v230_v27  ;;  %v296_v32 = vld [vmem:[#allocation8 + $0x218] sm:$0xff]  ;;  %v229_v33 = vld [vmem:[#allocation8] sm:$0xff] }
  0x40   :  { %v231_v34 = vld [vmem:[#allocation8 + $0x10] sm:$0xff]  ;;  %v390_v35 = vpack.c.bf16 %v296_v32, %v294_v29  ;;  %v293_v36 = vld [vmem:[#allocation8 + $0x200] sm:$0xff]  ;;  %v234_v38 = vld [vmem:[#allocation8 + $0x28] sm:$0xff] }
  0x41   :  { %126 = vmatpush1.bf16.msra.mxu0 %v93_v22  ;;  %v295_v37 = vld [vmem:[#allocation8 + $0x210] sm:$0xff]  ;;  %v357_v39 = vpack.c.bf16 %v231_v34, %v229_v33  ;;  %v236_v41 = vld [vmem:[#allocation8 + $0x38] sm:$0xff]  ;;  %v298_v42 = vld [vmem:[#allocation8 + $0x228] sm:$0xff] }
  0x42   :  { %169 = vmatpush1.bf16.msra.mxu1 %v95_v26  ;;  %v389_v40 = vpack.c.bf16 %v295_v37, %v293_v36  ;;  %v300_v43 = vld [vmem:[#allocation8 + $0x238] sm:$0xff]  ;;  %476 = vmatprep.subr.bf16.mxu0 %v390_v35  ;;  %v360_v44 = vpack.c.bf16 %v236_v41, %v234_v38  ;;  %v233_v46 = vld [vmem:[#allocation8 + $0x20] sm:$0xff]  ;;  %v235_v47 = vld [vmem:[#allocation8 + $0x30] sm:$0xff] }
  0x43   :  { %433 = vmatprep.subr.bf16.mxu1 %v358_v31  ;;  %v392_v45 = vpack.c.bf16 %v300_v43, %v298_v42  ;;  %v297_v48 = vld [vmem:[#allocation8 + $0x220] sm:$0xff]  ;;  %v299_v49 = vld [vmem:[#allocation8 + $0x230] sm:$0xff]  ;;  %v238_v50 = vld [vmem:[#allocation8 + $0x48] sm:$0xff]  ;;  %v359_v55 = vpack.c.bf16 %v235_v47, %v233_v46 }
  0x44   :  { %601 = vmatmul.mubr.msk.bf16.vlgmr.msra.gmra.mrb[0].mxu0 %vm119_vm0, %v72_v30  ;;  %v240_v51 = vld [vmem:[#allocation8 + $0x58] sm:$0xff]  ;;  %v391_v52 = vpack.c.bf16 %v299_v49, %v297_v48  ;;  %v302_v53 = vld [vmem:[#allocation8 + $0x248] sm:$0xff]  ;;  %v301_v57 = vld [vmem:[#allocation8 + $0x240] sm:$0xff] }
  0x45   :  { %602 = vmatmul.mubr.msk.bf16.vlgmr.msra.gmra.mrb[0].mxu1 %vm119_vm0, %v72_v30  ;;  %477 = vmatpush1.bf16.msra.mxu0 %v389_v40  ;;  %v304_v54 = vld [vmem:[#allocation8 + $0x258] sm:$0xff]  ;;  %v303_v58 = vld [vmem:[#allocation8 + $0x250] sm:$0xff]  ;;  %v362_v59 = vpack.c.bf16 %v240_v51, %v238_v50  ;;  %v237_v60 = vld [vmem:[#allocation8 + $0x40] sm:$0xff] }
  0x46   :  { %434 = vmatpush1.bf16.msra.mxu1 %v357_v39  ;;  %478 = vmatprep.subr.bf16.mxu0 %v392_v45  ;;  %v394_v56 = vpack.c.bf16 %v304_v54, %v302_v53  ;;  %v239_v61 = vld [vmem:[#allocation8 + $0x50] sm:$0xff]  ;;  %v306_v62 = vld [vmem:[#allocation8 + $0x268] sm:$0xff]  ;;  %v244_v0 = vld [vmem:[#allocation8 + $0x78] sm:$0xff]  ;;  %v393_v2 = vpack.c.bf16 %v303_v58, %v301_v57 }
  0x47   :  { %435 = vmatprep.subr.bf16.mxu1 %v360_v44  ;;  %v242_v63 = vld [vmem:[#allocation8 + $0x68] sm:$0xff]  ;;  %v308_v1 = vld [vmem:[#allocation8 + $0x278] sm:$0xff]  ;;  %v361_v3 = vpack.c.bf16 %v239_v61, %v237_v60  ;;  %v241_v5 = vld [vmem:[#allocation8 + $0x60] sm:$0xff] }
  0x48   :  { %v396_v4 = vpack.c.bf16 %v308_v1, %v306_v62  ;;  %v305_v6 = vld [vmem:[#allocation8 + $0x260] sm:$0xff]  ;;  %v307_v7 = vld [vmem:[#allocation8 + $0x270] sm:$0xff]  ;;  %v364_v8 = vpack.c.bf16 %v244_v0, %v242_v63  ;;  %v310_v10 = vld [vmem:[#allocation8 + $0x288] sm:$0xff] }
  0x49   :  { %479 = vmatpush1.bf16.msra.mxu0 %v391_v52  ;;  %v243_v9 = vld [vmem:[#allocation8 + $0x70] sm:$0xff]  ;;  %v312_v11 = vld [vmem:[#allocation8 + $0x298] sm:$0xff]  ;;  %v246_v12 = vld [vmem:[#allocation8 + $0x88] sm:$0xff]  ;;  %v395_v14 = vpack.c.bf16 %v307_v7, %v305_v6 }
  0x4a   :  { %436 = vmatpush1.bf16.msra.mxu1 %v359_v55  ;;  %480 = vmatprep.subr.bf16.mxu0 %v394_v56  ;;  %v248_v13 = vld [vmem:[#allocation8 + $0x98] sm:$0xff]  ;;  %v363_v15 = vpack.c.bf16 %v243_v9, %v241_v5  ;;  %v398_v16 = vpack.c.bf16 %v312_v11, %v310_v10  ;;  %v245_v17 = vld [vmem:[#allocation8 + $0x80] sm:$0xff]  ;;  %v311_v19 = vld [vmem:[#allocation8 + $0x290] sm:$0xff] }
  0x4b   :  { %437 = vmatprep.subr.bf16.mxu1 %v362_v59  ;;  %v309_v18 = vld [vmem:[#allocation8 + $0x280] sm:$0xff]  ;;  %v366_v20 = vpack.c.bf16 %v248_v13, %v246_v12  ;;  %v247_v21 = vld [vmem:[#allocation8 + $0x90] sm:$0xff]  ;;  %v314_v22 = vld [vmem:[#allocation8 + $0x2a8] sm:$0xff] }
  0x4c   :  { %v316_v23 = vld [vmem:[#allocation8 + $0x2b8] sm:$0xff]  ;;  %v250_v24 = vld [vmem:[#allocation8 + $0xa8] sm:$0xff]  ;;  %v397_v26 = vpack.c.bf16 %v311_v19, %v309_v18  ;;  %v365_v27 = vpack.c.bf16 %v247_v21, %v245_v17  ;;  %v249_v29 = vld [vmem:[#allocation8 + $0xa0] sm:$0xff] }
  0x4d   :  { %481 = vmatpush1.bf16.msra.mxu0 %v393_v2  ;;  %v252_v25 = vld [vmem:[#allocation8 + $0xb8] sm:$0xff]  ;;  %v400_v28 = vpack.c.bf16 %v316_v23, %v314_v22  ;;  %v313_v30 = vld [vmem:[#allocation8 + $0x2a0] sm:$0xff]  ;;  %v315_v31 = vld [vmem:[#allocation8 + $0x2b0] sm:$0xff] }
  0x4e   :  { %438 = vmatpush1.bf16.msra.mxu1 %v361_v3  ;;  %482 = vmatprep.subr.bf16.mxu0 %v396_v4  ;;  %v368_v32 = vpack.c.bf16 %v252_v25, %v250_v24  ;;  %v251_v33 = vld [vmem:[#allocation8 + $0xb0] sm:$0xff]  ;;  %v318_v34 = vld [vmem:[#allocation8 + $0x2c8] sm:$0xff]  ;;  %v320_v35 = vld [vmem:[#allocation8 + $0x2d8] sm:$0xff]  ;;  %v399_v38 = vpack.c.bf16 %v315_v31, %v313_v30 }
  0x4f   :  { %439 = vmatprep.subr.bf16.mxu1 %v364_v8  ;;  %v254_v36 = vld [vmem:[#allocation8 + $0xc8] sm:$0xff]  ;;  %v256_v37 = vld [vmem:[#allocation8 + $0xd8] sm:$0xff]  ;;  %v367_v39 = vpack.c.bf16 %v251_v33, %v249_v29  ;;  %v402_v40 = vpack.c.bf16 %v320_v35, %v318_v34  ;;  %v253_v41 = vld [vmem:[#allocation8 + $0xc0] sm:$0xff] }
  0x50   :  { %v317_v42 = vld [vmem:[#allocation8 + $0x2c0] sm:$0xff]  ;;  %v319_v43 = vld [vmem:[#allocation8 + $0x2d0] sm:$0xff]  ;;  %v370_v44 = vpack.c.bf16 %v256_v37, %v254_v36  ;;  %v322_v46 = vld [vmem:[#allocation8 + $0x2e8] sm:$0xff] }
  0x51   :  { %483 = vmatpush1.bf16.msra.mxu0 %v395_v14  ;;  %v255_v45 = vld [vmem:[#allocation8 + $0xd0] sm:$0xff]  ;;  %v324_v47 = vld [vmem:[#allocation8 + $0x2f8] sm:$0xff]  ;;  %v258_v48 = vld [vmem:[#allocation8 + $0xe8] sm:$0xff]  ;;  %v401_v50 = vpack.c.bf16 %v319_v43, %v317_v42 }
  0x52   :  { %440 = vmatpush1.bf16.msra.mxu1 %v363_v15  ;;  %484 = vmatprep.subr.bf16.mxu0 %v398_v16  ;;  %v260_v49 = vld [vmem:[#allocation8 + $0xf8] sm:$0xff]  ;;  %v369_v51 = vpack.c.bf16 %v255_v45, %v253_v41  ;;  %v404_v52 = vpack.c.bf16 %v324_v47, %v322_v46  ;;  %v257_v53 = vld [vmem:[#allocation8 + $0xe0] sm:$0xff]  ;;  %v323_v55 = vld [vmem:[#allocation8 + $0x2f0] sm:$0xff] }
  0x53   :  { %441 = vmatprep.subr.bf16.mxu1 %v366_v20  ;;  %v321_v54 = vld [vmem:[#allocation8 + $0x2e0] sm:$0xff]  ;;  %v372_v56 = vpack.c.bf16 %v260_v49, %v258_v48  ;;  %v259_v57 = vld [vmem:[#allocation8 + $0xf0] sm:$0xff]  ;;  %v326_v58 = vld [vmem:[#allocation8 + $0x308] sm:$0xff] }
  0x54   :  { %v328_v59 = vld [vmem:[#allocation8 + $0x318] sm:$0xff]  ;;  %v262_v60 = vld [vmem:[#allocation8 + $0x108] sm:$0xff]  ;;  %v403_v62 = vpack.c.bf16 %v323_v55, %v321_v54  ;;  %v371_v63 = vpack.c.bf16 %v259_v57, %v257_v53  ;;  %v261_v1 = vld [vmem:[#allocation8 + $0x100] sm:$0xff] }
  0x55   :  { %485 = vmatpush1.bf16.msra.mxu0 %v397_v26  ;;  %v264_v61 = vld [vmem:[#allocation8 + $0x118] sm:$0xff]  ;;  %v406_v0 = vpack.c.bf16 %v328_v59, %v326_v58  ;;  %v325_v2 = vld [vmem:[#allocation8 + $0x300] sm:$0xff]  ;;  %v327_v3 = vld [vmem:[#allocation8 + $0x310] sm:$0xff] }
  0x56   :  { %442 = vmatpush1.bf16.msra.mxu1 %v365_v27  ;;  %486 = vmatprep.subr.bf16.mxu0 %v400_v28  ;;  %v374_v4 = vpack.c.bf16 %v264_v61, %v262_v60  ;;  %v263_v5 = vld [vmem:[#allocation8 + $0x110] sm:$0xff]  ;;  %v330_v6 = vld [vmem:[#allocation8 + $0x328] sm:$0xff]  ;;  %v332_v7 = vld [vmem:[#allocation8 + $0x338] sm:$0xff]  ;;  %v405_v10 = vpack.c.bf16 %v327_v3, %v325_v2 }
  0x57   :  { %443 = vmatprep.subr.bf16.mxu1 %v368_v32  ;;  %v266_v8 = vld [vmem:[#allocation8 + $0x128] sm:$0xff]  ;;  %v268_v9 = vld [vmem:[#allocation8 + $0x138] sm:$0xff]  ;;  %v373_v11 = vpack.c.bf16 %v263_v5, %v261_v1  ;;  %v408_v12 = vpack.c.bf16 %v332_v7, %v330_v6  ;;  %v265_v13 = vld [vmem:[#allocation8 + $0x120] sm:$0xff] }
  0x58   :  { %v329_v14 = vld [vmem:[#allocation8 + $0x320] sm:$0xff]  ;;  %v331_v15 = vld [vmem:[#allocation8 + $0x330] sm:$0xff]  ;;  %v376_v16 = vpack.c.bf16 %v268_v9, %v266_v8  ;;  %v334_v18 = vld [vmem:[#allocation8 + $0x348] sm:$0xff] }
  0x59   :  { %487 = vmatpush1.bf16.msra.mxu0 %v399_v38  ;;  %v267_v17 = vld [vmem:[#allocation8 + $0x130] sm:$0xff]  ;;  %v336_v19 = vld [vmem:[#allocation8 + $0x358] sm:$0xff]  ;;  %v270_v20 = vld [vmem:[#allocation8 + $0x148] sm:$0xff]  ;;  %v407_v22 = vpack.c.bf16 %v331_v15, %v329_v14 }
  0x5a   :  { %444 = vmatpush1.bf16.msra.mxu1 %v367_v39  ;;  %488 = vmatprep.subr.bf16.mxu0 %v402_v40  ;;  %v272_v21 = vld [vmem:[#allocation8 + $0x158] sm:$0xff]  ;;  %v375_v23 = vpack.c.bf16 %v267_v17, %v265_v13  ;;  %v410_v24 = vpack.c.bf16 %v336_v19, %v334_v18  ;;  %v269_v25 = vld [vmem:[#allocation8 + $0x140] sm:$0xff]  ;;  %v335_v27 = vld [vmem:[#allocation8 + $0x350] sm:$0xff] }
  0x5b   :  { %445 = vmatprep.subr.bf16.mxu1 %v370_v44  ;;  %v333_v26 = vld [vmem:[#allocation8 + $0x340] sm:$0xff]  ;;  %v378_v28 = vpack.c.bf16 %v272_v21, %v270_v20  ;;  %v271_v29 = vld [vmem:[#allocation8 + $0x150] sm:$0xff]  ;;  %v338_v30 = vld [vmem:[#allocation8 + $0x368] sm:$0xff] }
  0x5c   :  { %v340_v31 = vld [vmem:[#allocation8 + $0x378] sm:$0xff]  ;;  %v274_v32 = vld [vmem:[#allocation8 + $0x168] sm:$0xff]  ;;  %v409_v34 = vpack.c.bf16 %v335_v27, %v333_v26  ;;  %v377_v35 = vpack.c.bf16 %v271_v29, %v269_v25  ;;  %v273_v37 = vld [vmem:[#allocation8 + $0x160] sm:$0xff] }
  0x5d   :  { %489 = vmatpush1.bf16.msra.mxu0 %v401_v50  ;;  %v276_v33 = vld [vmem:[#allocation8 + $0x178] sm:$0xff]  ;;  %v412_v36 = vpack.c.bf16 %v340_v31, %v338_v30  ;;  %v337_v38 = vld [vmem:[#allocation8 + $0x360] sm:$0xff]  ;;  %v339_v39 = vld [vmem:[#allocation8 + $0x370] sm:$0xff] }
  0x5e   :  { %446 = vmatpush1.bf16.msra.mxu1 %v369_v51  ;;  %490 = vmatprep.subr.bf16.mxu0 %v404_v52  ;;  %v380_v40 = vpack.c.bf16 %v276_v33, %v274_v32  ;;  %v275_v41 = vld [vmem:[#allocation8 + $0x170] sm:$0xff]  ;;  %v342_v42 = vld [vmem:[#allocation8 + $0x388] sm:$0xff]  ;;  %v344_v43 = vld [vmem:[#allocation8 + $0x398] sm:$0xff]  ;;  %v411_v46 = vpack.c.bf16 %v339_v39, %v337_v38 }
  0x5f   :  { %447 = vmatprep.subr.bf16.mxu1 %v372_v56  ;;  %v278_v44 = vld [vmem:[#allocation8 + $0x188] sm:$0xff]  ;;  %v280_v45 = vld [vmem:[#allocation8 + $0x198] sm:$0xff]  ;;  %v379_v47 = vpack.c.bf16 %v275_v41, %v273_v37  ;;  %v414_v48 = vpack.c.bf16 %v344_v43, %v342_v42  ;;  %v341_v49 = vld [vmem:[#allocation8 + $0x380] sm:$0xff] }
  0x60   :  { %v343_v50 = vld [vmem:[#allocation8 + $0x390] sm:$0xff]  ;;  %v382_v51 = vpack.c.bf16 %v280_v45, %v278_v44  ;;  %v277_v52 = vld [vmem:[#allocation8 + $0x180] sm:$0xff]  ;;  %v282_v56 = vld [vmem:[#allocation8 + $0x1a8] sm:$0xff] }
  0x61   :  { %491 = vmatpush1.bf16.msra.mxu0 %v403_v62  ;;  %v279_v53 = vld [vmem:[#allocation8 + $0x190] sm:$0xff]  ;;  %v413_v54 = vpack.c.bf16 %v343_v50, %v341_v49  ;;  %v284_v57 = vld [vmem:[#allocation8 + $0x1b8] sm:$0xff]  ;;  %v346_v58 = vld [vmem:[#allocation8 + $0x3a8] sm:$0xff] }
  0x62   :  { %448 = vmatpush1.bf16.msra.mxu1 %v371_v63  ;;  %492 = vmatprep.subr.bf16.mxu0 %v406_v0  ;;  %v381_v55 = vpack.c.bf16 %v279_v53, %v277_v52  ;;  %v384_v59 = vpack.c.bf16 %v284_v57, %v282_v56  ;;  %v348_v60 = vld [vmem:[#allocation8 + $0x3b8] sm:$0xff]  ;;  %v281_v61 = vld [vmem:[#allocation8 + $0x1a0] sm:$0xff]  ;;  %v283_v62 = vld [vmem:[#allocation8 + $0x1b0] sm:$0xff] }
  0x63   :  { %449 = vmatprep.subr.bf16.mxu1 %v374_v4  ;;  %v416_v63 = vpack.c.bf16 %v348_v60, %v346_v58  ;;  %v383_v0 = vpack.c.bf16 %v283_v62, %v281_v61  ;;  %v345_v1 = vld [vmem:[#allocation8 + $0x3a0] sm:$0xff]  ;;  %v347_v2 = vld [vmem:[#allocation8 + $0x3b0] sm:$0xff]  ;;  %v286_v4 = vld [vmem:[#allocation8 + $0x1c8] sm:$0xff] }
  0x64   :  { %v415_v3 = vpack.c.bf16 %v347_v2, %v345_v1  ;;  %v288_v5 = vld [vmem:[#allocation8 + $0x1d8] sm:$0xff]  ;;  %v350_v6 = vld [vmem:[#allocation8 + $0x3c8] sm:$0xff]  ;;  %v285_v9 = vld [vmem:[#allocation8 + $0x1c0] sm:$0xff] }
  0x65   :  { %493 = vmatpush1.bf16.msra.mxu0 %v405_v10  ;;  %v386_v7 = vpack.c.bf16 %v288_v5, %v286_v4  ;;  %v352_v8 = vld [vmem:[#allocation8 + $0x3d8] sm:$0xff]  ;;  %v287_v10 = vld [vmem:[#allocation8 + $0x1d0] sm:$0xff]  ;;  %v349_v13 = vld [vmem:[#allocation8 + $0x3c0] sm:$0xff] }
  0x66   :  { %450 = vmatpush1.bf16.msra.mxu1 %v373_v11  ;;  %494 = vmatprep.subr.bf16.mxu0 %v408_v12  ;;  %v418_v11 = vpack.c.bf16 %v352_v8, %v350_v6  ;;  %v385_v12 = vpack.c.bf16 %v287_v10, %v285_v9  ;;  %v351_v14 = vld [vmem:[#allocation8 + $0x3d0] sm:$0xff]  ;;  %v292_v17 = vld [vmem:[#allocation8 + $0x1f8] sm:$0xff]  ;;  %v354_v18 = vld [vmem:[#allocation8 + $0x3e8] sm:$0xff] }
  0x67   :  { %451 = vmatprep.subr.bf16.mxu1 %v376_v16  ;;  %v417_v15 = vpack.c.bf16 %v351_v14, %v349_v13  ;;  %v290_v16 = vld [vmem:[#allocation8 + $0x1e8] sm:$0xff]  ;;  %v356_v20 = vld [vmem:[#allocation8 + $0x3f8] sm:$0xff]  ;;  %v289_v21 = vld [vmem:[#allocation8 + $0x1e0] sm:$0xff] }
  0x68   :  { %v388_v19 = vpack.c.bf16 %v292_v17, %v290_v16  ;;  %v353_v25 = vld [vmem:[#allocation8 + $0x3e0] sm:$0xff]  ;;  %v355_v26 = vld [vmem:[#allocation8 + $0x3f0] sm:$0xff] }
  0x69   :  { %495 = vmatpush1.bf16.msra.mxu0 %v407_v22  ;;  %v291_v22 = vld [vmem:[#allocation8 + $0x1f0] sm:$0xff]  ;;  %v419_v27 = vpack.c.bf16 %v355_v26, %v353_v25 }
  0x6a   :  { %452 = vmatpush1.bf16.msra.mxu1 %v375_v23  ;;  %496 = vmatprep.subr.bf16.mxu0 %v410_v24  ;;  %v420_v23 = vpack.c.bf16 %v356_v20, %v354_v18  ;;  %v387_v24 = vpack.c.bf16 %v291_v22, %v289_v21  ;;  %v97_v31 = vld [vmem:[%s861_s2] sm:$0xf] }
  0x6b   :  { %453 = vmatprep.subr.bf16.mxu1 %v378_v28  ;;  %v99_v28 = vlaneseq  ;;  %v527_v21 = vld [vmem:[%s864_s5] sm:$0x3] }
  0x6d   :  { %497 = vmatpush1.bf16.msra.mxu0 %v409_v34  ;;  %v816_v29 = vshrl.u32 %v99_v28, 7 }
  0x6e   :  { %454 = vmatpush1.bf16.msra.mxu1 %v377_v35  ;;  %498 = vmatprep.subr.bf16.mxu0 %v412_v36 }
  0x6f   :  { %455 = vmatprep.subr.bf16.mxu1 %v380_v40  ;;  %v819_v30 = vsub.s32 0, %v816_v29  ;;  %v109_v32 = vsub.s32 2, %v816_v29  ;;  %v826_v33 = vsub.s32 1, %v816_v29  ;;  %v113_v34 = vsub.s32 3, %v816_v29 }
  0x71   :  { %499 = vmatpush1.bf16.msra.mxu0 %v411_v46  ;;  %v102_v35 = vrot.slane %v97_v31, %v819_v30  ;;  %v110_v36 = vrot.slane %v97_v31, %v109_v32  ;;  %v106_v37 = vrot.slane %v97_v31, %v826_v33  ;;  %v114_v38 = vrot.slane %v97_v31, %v113_v34 }
  0x72   :  { %456 = vmatpush1.bf16.msra.mxu1 %v379_v47  ;;  %500 = vmatprep.subr.bf16.mxu0 %v414_v48 }
  0x73   :  { %457 = vmatprep.subr.bf16.mxu1 %v382_v51 }
  0x75   :  { %501 = vmatpush1.bf16.msra.mxu0 %v413_v54 }
  0x76   :  { %458 = vmatpush1.bf16.msra.mxu1 %v381_v55  ;;  %502 = vmatprep.subr.bf16.mxu0 %v416_v63 }
  0x77   :  { %459 = vmatprep.subr.bf16.mxu1 %v384_v59 }
  0x79   :  { %503 = vmatpush1.bf16.msra.mxu0 %v415_v3 }
  0x7a   :  { %460 = vmatpush1.bf16.msra.mxu1 %v383_v0  ;;  %504 = vmatprep.subr.bf16.mxu0 %v418_v11  ;;  %v421_v11 = vld [vmem:[%s863_s4] sm:$0x3] }
  0x7b   :  { %461 = vmatprep.subr.bf16.mxu1 %v386_v7  ;;  %v430_v13 = vrot.slane %v421_v11, %v826_v33 }
  0x7d   :  { %505 = vmatpush1.bf16.msra.mxu0 %v417_v15 }
  0x7e   :  { %462 = vmatpush1.bf16.msra.mxu1 %v385_v12  ;;  %506 = vmatprep.subr.bf16.mxu0 %v420_v23  ;;  %v426_v12 = vrot.slane %v421_v11, %v819_v30 }
  0x7f   :  { %463 = vmatprep.subr.bf16.mxu1 %v388_v19 }
  0x81   :  { %507 = vmatpush1.bf16.msra.mxu0 %v419_v27 }
  0x82   :  { %464 = vmatpush1.bf16.msra.mxu1 %v387_v24 }
 0x117   :  { %v157_v39 = vpop.f32.mrb[0].mxu0 }
 0x118   :  { %v158_v40 = vadd.f32 %v157_v39, %v102_v35  ;;  %v200_v41 = vpop.f32.mrb[0].mxu1  ;;  %v159_v42 = vpop.f32.mrb[1].mxu0 }
 0x119   :  { %v201_v43 = vadd.f32 %v200_v41, %v110_v36  ;;  %v160_v44 = vadd.f32 %v159_v42, %v106_v37  ;;  %v202_v45 = vpop.f32.mrb[1].mxu1  ;;  %v161_v46 = vpop.f32.mrb[2].mxu0 }
 0x11a   :  { %v209_v47 = vmul.f32 0.2, %v158_v40  ;;  %v203_v48 = vadd.f32 %v202_v45, %v114_v38  ;;  %v162_v49 = vadd.f32 %v161_v46, %v102_v35  ;;  %v204_v50 = vpop.f32.mrb[2].mxu1  ;;  %v163_v51 = vpop.f32.mrb[3].mxu0  ;;  %v532_v35 = vrot.slane %v527_v21, %v819_v30 }
 0x11b   :  { %v211_v52 = vmul.f32 0.2, %v201_v43  ;;  %v210_v53 = vmul.f32 0.2, %v160_v44  ;;  %v205_v54 = vadd.f32 %v204_v50, %v110_v36  ;;  %v164_v55 = vadd.f32 %v163_v51, %v106_v37  ;;  %v206_v56 = vpop.f32.mrb[3].mxu1 }
 0x11c   :  { %v212_v57 = vmul.f32 0.2, %v203_v48  ;;  %v213_v58 = vmul.f32 0.2, %v162_v49  ;;  %v207_v59 = vadd.f32 %v206_v56, %v114_v38  ;;  %v217_v62 = vmax.f32 %v158_v40, %v209_v47 }
 0x11d   :  { %v215_v60 = vmul.f32 0.2, %v205_v54  ;;  %v214_v61 = vmul.f32 0.2, %v164_v55  ;;  %v219_v1 = vmax.f32 %v201_v43, %v211_v52  ;;  %v218_v2 = vmax.f32 %v160_v44, %v210_v53 }
 0x11e   :  { %v221_v63 = vmax.f32 %v162_v49, %v213_v58  ;;  %v216_v0 = vmul.f32 0.2, %v207_v59  ;;  %v220_v5 = vmax.f32 %v203_v48, %v212_v57  ;;  %v536_v38 = vrot.slane %v527_v21, %v826_v33 }
 0x11f   :  { %v223_v3 = vmax.f32 %v205_v54, %v215_v60  ;;  %v222_v4 = vmax.f32 %v164_v55, %v214_v61  ;;  %v550_v30 = vstv %s865_s6  ;;  %s736_s6 = smov [#allocation9]  }
 0x120   :  { %v225_v6 = vpack.c.bf16 %v221_v63, %v217_v62  ;;  %v224_v7 = vmax.f32 %v207_v59, %v216_v0  ;;  %v570_v0 = vand.u32 127, %v99_v28  ;;  %s591_s22 = sshll.u32 %s736_s6, 4  ;;  %s592_s22 = int_to_ptr.vmem [resolvable:$true] %s591_s22 }
 0x121   :  { %v227_v8 = vpack.c.bf16 %v223_v3, %v219_v1  ;;  %v226_v9 = vpack.c.bf16 %v222_v4, %v218_v2  ;;  %s698_s23 = scalar_lea.vmem %s592_s22, 16  ;;  %s702_s24 = scalar_lea.vmem %s592_s22, 32 }
 0x122   :  { %v228_v10 = vpack.c.bf16 %v224_v7, %v220_v5  ;;  %v575_v1 = vadd.s32 4294967288, %v570_v0  ;;  %v573_v2 = vsub.s32 %v570_v0, %v816_v29  ;;  %p699_p10 = scmp.ne.s32.totalorder %s592_s22, %s698_s23  ;;  %p703_p11 = scmp.lt.s32.totalorder %s592_s22, %s592_s22 }
 0x123   :  { %465 = vmatprep.mubr.bf16.mxu1 %v226_v9  ;;  %p704_p12 = scmp.lt.s32.totalorder %s702_s24, %s698_s23 }
 0x124   :  { %508 = vmatprep.mubr.bf16.mxu0 %v228_v10  ;;  %466 = vmatmul.mubr.bf16.vlgmr.msra.gmra.mrb[4].mxu1 %v225_v6  ;;  %v578_v3 = vsub.s32 %v575_v1, %v816_v29 }
 0x125   :  { %509 = vmatmul.mubr.bf16.vlgmr.msra.gmra.mrb[4].mxu0 %v227_v8  ;;  %p705_p13 = por %p704_p12, %p703_p11 }
 0x127   :  { %p706_p0 = pnand %p705_p13, %p699_p10 }
 0x1f7   :  { %v467_v14 = vpop.f32.mrb[4].mxu1 }
 0x1f8   :  { %v468_v15 = vadd.f32 %v467_v14, %v426_v12  ;;  %v510_v16 = vpop.f32.mrb[4].mxu0  ;;  %v469_v17 = vpop.f32.mrb[5].mxu1 }
 0x1f9   :  { %v470_v18 = vadd.f32 %v469_v17, %v430_v13  ;;  %v512_v19 = vpop.f32.mrb[5].mxu0  ;;  %v471_v20 = vpop.f32.mrb[6].mxu1 }
 0x1fa   :  { %v511_v22 = vadd.f32 %v510_v16, %v468_v15  ;;  %v472_v23 = vadd.f32 %v471_v20, %v426_v12  ;;  %v514_v24 = vpop.f32.mrb[6].mxu0  ;;  %v473_v25 = vpop.f32.mrb[7].mxu1 }
 0x1fb   :  { %v513_v26 = vadd.f32 %v512_v19, %v470_v18  ;;  %v474_v27 = vadd.f32 %v473_v25, %v430_v13  ;;  %v516_v31 = vpop.f32.mrb[7].mxu0 }
 0x1fc   :  { %v519_v32 = vmul.f32 0.2, %v511_v22  ;;  %v515_v34 = vadd.f32 %v514_v24, %v472_v23 }
 0x1fd   :  { %v520_v36 = vmul.f32 0.2, %v513_v26  ;;  %v517_v37 = vadd.f32 %v516_v31, %v474_v27 }
 0x1fe   :  { %v523_v39 = vmax.f32 %v511_v22, %v519_v32  ;;  %v521_v40 = vmul.f32 0.2, %v515_v34 }
 0x1ff   :  { %v524_v41 = vmax.f32 %v513_v26, %v520_v36  ;;  %v522_v42 = vmul.f32 0.2, %v517_v37 }
 0x200   :  { %v525_v43 = vmax.f32 %v515_v34, %v521_v40  ;;  %v539_v44 = vmul.f32 %v532_v35, %v523_v39 }
 0x201   :  { %v526_v45 = vmax.f32 %v517_v37, %v522_v42  ;;  %v540_v46 = vmul.f32 %v536_v38, %v524_v41 }
 0x202   :  { %v541_v47 = vmul.f32 %v532_v35, %v525_v43 }
 0x203   :  { %v543_v48 = vadd.f32 %v540_v46, %v539_v44  ;;  %v542_v49 = vmul.f32 %v536_v38, %v526_v45 }
 0x205   :  { %544 = vadd.xlane.f32.xlu0 %v543_v48  ;;  %v546_v50 = vadd.f32 %v542_v49, %v541_v47 }
 0x209   :  { %547 = vadd.xlane.f32.xlu0 %v546_v50 }
 0x292   :  { %v545_v51 = vpop.xlane.xlu0 %544 }
 0x293   :  { %v551_v33 = vadd.f32 %v550_v30, %v545_v51 }
 0x295   :  { %v603_v52 = vclamps-f32 %v551_v33, 30.0 }
 0x296   :  { %v548_v53 = vpop.xlane.xlu0 %547 }
 0x297   :  { %v557_v54 = vsub.f32 0.0, %v603_v52  ;;  %v552_v55 = vadd.f32 %v550_v30, %v548_v53 }
 0x299   :  { %v559_v56 = vmul.f32 1.442695, %v557_v54  ;;  %v604_v57 = vclamps-f32 %v552_v55, 30.0 }
 0x29b   :  { %624 = vpow2.f32 %v559_v56  ;;  %v558_v58 = vsub.f32 0.0, %v604_v57 }
 0x29d   :  { %v561_v59 = vmul.f32 1.442695, %v558_v58 }
 0x29f   :  { %626 = vpow2.f32 %v561_v59 }
 0x2a5   :  { %v625_v60 = vpop.eup %624 }
 0x2a6   :  { %v563_v61 = vadd.f32 1.0, %v625_v60 }
 0x2a8   :  { %628 = vrcp.f32 %v563_v61 }
 0x2a9   :  { %v627_v62 = vpop.eup %626 }
 0x2aa   :  { %v564_v63 = vadd.f32 1.0, %v627_v62 }
 0x2ac   :  { %630 = vrcp.f32 %v564_v63 }
 0x2b2   :  { %v629_v4 = vpop.eup %628 }
 0x2b3   :  { %v574_v6 = vrot.slane %v629_v4, %v573_v2 }
 0x2b6   :  { %v631_v5 = vpop.eup %630 }
 0x2b7   :  { %v579_v7 = vrot.slane %v631_v5, %v578_v3 }
 0x2b9   :  { %v581_v8 = vsel %vm580_vm1, %v579_v7, %v574_v6 }
 0x2ba   :  { %584 = vst.msk [vmem:[#allocation9] sm:$0x1] %vm583_vm2, %v581_v8 }
 0x2bb   :  { %709 = shalt.err (!%p706_p0)
}
 0x2bc   :  { %s710_s26 = scalar_lea.hbm %s866_s7, 16 }
 0x2bd   :  { %p711_p1 = scmp.ne.s32.totalorder %s866_s7, %s710_s26  ;;  %p714_p2 = scmp.lt.u32.totalorder %s710_s26, %s866_s7 }
 0x2bf   :  { %p716_p3 = pnand %p714_p2, %p711_p1 }
 0x2c1   :  { %719 = shalt.err (!%p716_p3)
}
 0x2c2   :  { %594 = dma.vmem_to_hbm [thread:$0]  %s592_s22, 16, %s866_s7, [#allocation5]  }
 0x2c3   :  { %724 = dma.done.wait [#allocation5], 16  }
 0x2c4   :  { %725 = vsyncadd [#allocation5], 4294967280 }
 0x2c5   :  { %598 = vsyncpa [#allocation4], 1 }
 0x2c6   :  { %599 = vsyncpa [#allocation7], 1 }
 0x2c7   :  { %600 = vsyncpa [#allocation5], 1 }

</bundles_post_ra>
